<compile_context>
chip_gen: v6e
topology: v6e:2x2x1
jax: 0.10.0
libtpu: 0.0.40
codegen_flags: <defaults>
</compile_context>

<pallas_src>
import jax
import jax.numpy as jnp
from jax.experimental import pallas as pl
from jax.experimental.pallas import tpu as pltpu


def _head_kernel(x_ref, w_ref, b_ref, o_ref):
    # x_ref: [TILE_N, HW, C] (channels on lanes)
    # w_ref: [C, K_pad]   b_ref: [1, K_pad]   o_ref: [TILE_N, K_pad]
    hw = x_ref.shape[1]  # static
    # Adaptive avg pool + flatten: sublane reduce over HW, accumulate in f32.
    pooled = jnp.sum(x_ref[...], axis=1, dtype=jnp.float32) * (1.0 / hw)  # [TILE_N, C]
    # Linear(512, K): MXU matmul with f32 accumulation, lane-dense output.
    y = jnp.dot(pooled, w_ref[...].astype(jnp.float32),
                preferred_element_type=jnp.float32)                      # [TILE_N, K_pad]
    y = y + b_ref[...].astype(jnp.float32)
    o_ref[...] = y.astype(o_ref.dtype)


def classifier_forward(x_nchw, w, b, *, tile_n=128):
    """x_nchw: [N, 512, H, W]; w: [512, n_classes]; b: [n_classes]."""
    N, C, H, W = x_nchw.shape
    HW = H * W
    n_classes = w.shape[1]
    k_pad = pl.cdiv(n_classes, 128) * 128

    # Layout plumbing (outside the kernel): put channels on the lane axis.
    x_nhwc = jnp.transpose(x_nchw.reshape(N, C, HW), (0, 2, 1))  # [N, HW, C]

    # Tile the batch axis; pad N to a multiple of the tile if needed.
    tile_n = min(tile_n, N)
    n_pad = pl.cdiv(N, tile_n) * tile_n
    if n_pad != N:
        x_nhwc = jnp.pad(x_nhwc, ((0, n_pad - N), (0, 0), (0, 0)))

    # Lane-pad the classifier weight/bias to a multiple of 128 output columns.
    w_pad = jnp.pad(w, ((0, 0), (0, k_pad - n_classes)))
    b_pad = jnp.pad(b, (0, k_pad - n_classes)).reshape(1, k_pad)

    itemsize = jnp.dtype(x_nchw.dtype).itemsize
    cost = pl.CostEstimate(
        flops=2 * n_pad * C * k_pad + n_pad * HW * C,
        transcendentals=0,
        bytes_accessed=(n_pad * HW * C * itemsize          # x
                        + C * k_pad * w_pad.dtype.itemsize  # w (resident)
                        + k_pad * b_pad.dtype.itemsize      # b
                        + n_pad * k_pad * itemsize),        # out
    )

    out = pl.pallas_call(
        _head_kernel,
        out_shape=jax.ShapeDtypeStruct((n_pad, k_pad), x_nchw.dtype),
        grid=(n_pad // tile_n,),
        in_specs=[
            pl.BlockSpec((tile_n, HW, C), lambda i: (i, 0, 0)),   # pipelined over N
            pl.BlockSpec((C, k_pad), lambda i: (0, 0)),           # W stays resident
            pl.BlockSpec((1, k_pad), lambda i: (0, 0)),           # b stays resident
        ],
        out_specs=pl.BlockSpec((tile_n, k_pad), lambda i: (i, 0)),
        compiler_params=pltpu.CompilerParams(
            dimension_semantics=("parallel",),
        ),
        cost_estimate=cost,
    )(x_nhwc, w_pad, b_pad)

    return out[:N, :n_classes]


def _reference(x_nchw, w, b):
    pooled = jnp.mean(x_nchw, axis=(2, 3))  # [N, 512]
    return pooled @ w + b


if __name__ == "__main__":
    key = jax.random.PRNGKey(0)
    k_x, k_w, k_b = jax.random.split(key, 3)

    N, C, H, W = 2, 512, 4, 4   # small spatial feature map out of the conv trunk
    n_classes = 10

    x = jax.random.normal(k_x, (N, C, H, W), dtype=jnp.float32)
    # Deterministic synthetic Linear(512, n_classes) params (PyTorch fan-in scale).
    bound = 1.0 / jnp.sqrt(jnp.float32(C))
    w = jax.random.uniform(k_w, (C, n_classes), jnp.float32, -bound, bound)
    b = jax.random.uniform(k_b, (n_classes,), jnp.float32, -bound, bound)

    y = classifier_forward(x, w, b)
    jax.block_until_ready(y)

    y_ref = _reference(x, w, b)
    assert y.shape == (N, n_classes)
    assert jnp.allclose(y, y_ref, atol=1e-4, rtol=1e-4), "mismatch vs reference"
    print("KERNEL_OK")
</pallas_src>

<mosaic_0001>
module attributes {stable_mosaic.version = 11 : i64} {
  func.func @_head_kernel(%arg0: i32, %arg1: memref<2x16x512xf32, #tpu.memory_space<vmem>>, %arg2: memref<512x128xf32, #tpu.memory_space<vmem>>, %arg3: memref<1x128xf32, #tpu.memory_space<vmem>>, %arg4: memref<2x128xf32, #tpu.memory_space<vmem>>) attributes {dimension_semantics = [#tpu.dimension_semantics<parallel>], iteration_bounds = array<i64: 1>, scalar_prefetch = 0 : i64, scratch_operands = 0 : i64, tpu.core_type = #tpu.core_type<tc>, window_params = [{transform_indices = @transform_0, window_bounds = array<i64: 2, 16, 512>}, {pipeline_mode = #tpu.pipeline_mode<synchronous>, transform_indices = @transform_1, window_bounds = array<i64: 512, 128>}, {pipeline_mode = #tpu.pipeline_mode<synchronous>, transform_indices = @transform_2, window_bounds = array<i64: 1, 128>}, {transform_indices = @transform_3, window_bounds = array<i64: 2, 128>}]} {
    %c0 = arith.constant 0 : index
    %c0_0 = arith.constant 0 : index
    %c0_1 = arith.constant 0 : index
    %0 = vector.load %arg1[%c0, %c0_0, %c0_1] : memref<2x16x512xf32, #tpu.memory_space<vmem>>, vector<2x16x512xf32>
    %cst = arith.constant dense<0.000000e+00> : vector<2x512xf32>
    %1 = vector.multi_reduction <add>, %0, %cst [1] : vector<2x16x512xf32> to vector<2x512xf32>
    %cst_2 = arith.constant 6.250000e-02 : f32
    %2 = vector.broadcast %cst_2 : f32 to vector<2x512xf32>
    %3 = arith.mulf %1, %2 : vector<2x512xf32>
    %c0_3 = arith.constant 0 : index
    %c0_4 = arith.constant 0 : index
    %4 = vector.load %arg2[%c0_3, %c0_4] : memref<512x128xf32, #tpu.memory_space<vmem>>, vector<512x128xf32>
    %cst_5 = arith.constant dense<0.000000e+00> : vector<2x128xf32>
    %5 = tpu.matmul %3, %4, %cst_5 {dimension_numbers = #tpu.dot_dimension_numbers<[1], [0], [0], [1], [0, 0, 1, 1], [], []>} : vector<2x512xf32>, vector<512x128xf32>, vector<2x128xf32> -> vector<2x128xf32>
    %c0_6 = arith.constant 0 : index
    %c0_7 = arith.constant 0 : index
    %6 = vector.load %arg3[%c0_6, %c0_7] : memref<1x128xf32, #tpu.memory_space<vmem>>, vector<1x128xf32>
    %7 = vector.broadcast %6 : vector<1x128xf32> to vector<2x128xf32>
    %8 = arith.addf %5, %7 : vector<2x128xf32>
    %c0_8 = arith.constant 0 : index
    %c0_9 = arith.constant 0 : index
    %9 = vector.load %arg4[%c0_8, %c0_9] : memref<2x128xf32, #tpu.memory_space<vmem>>, vector<2x128xf32>
    tpu.vector_store %arg4[%c0_8, %c0_9], %8 {strides = array<i32>} : memref<2x128xf32, #tpu.memory_space<vmem>>, vector<2x128xf32>,
    return
  }
  func.func @transform_0(%arg0: i32) -> (i32, i32, i32) {
    %c0_i32 = arith.constant 0 : i32
    %c0_i32_0 = arith.constant 0 : i32
    %c0_i32_1 = arith.constant 0 : i32
    return %arg0, %c0_i32, %c0_i32_0 : i32, i32, i32
  }
  func.func @transform_1(%arg0: i32) -> (i32, i32) {
    %c0_i32 = arith.constant 0 : i32
    %c0_i32_0 = arith.constant 0 : i32
    %c0_i32_1 = arith.constant 0 : i32
    return %c0_i32, %c0_i32_0 : i32, i32
  }
  func.func @transform_2(%arg0: i32) -> (i32, i32) {
    %c0_i32 = arith.constant 0 : i32
    %c0_i32_0 = arith.constant 0 : i32
    %c0_i32_1 = arith.constant 0 : i32
    return %c0_i32, %c0_i32_0 : i32, i32
  }
  func.func @transform_3(%arg0: i32) -> (i32, i32) {
    %c0_i32 = arith.constant 0 : i32
    %c0_i32_0 = arith.constant 0 : i32
    return %arg0, %c0_i32 : i32, i32
  }
}

</mosaic_0001>

<bundles_post_ra>
// kernel: tpu_custom_call.1
= control target key start
LH: loop header
LB: loop body
LE: loop exit
PB: predicated region body
PF: predicated region fallthrough
CT: control target
= control target key end

     0   :  { %8 = vsyncpa [#allocation3], 0  ;;  %s555_s0 = inlined_call_operand.hbm [shape: f32[2,16,512], index: 0, kind: input, shape index: {}]   ;;  %s556_s1 = inlined_call_operand.hbm [shape: f32[512,128], index: 1, kind: input, shape index: {}]   ;;  %s557_s2 = inlined_call_operand.vmem [shape: f32[1,128], index: 2, kind: input, shape index: {}]   ;;  %s558_s3 = inlined_call_operand.hbm [shape: f32[2,128], index: 3, kind: output, shape index: {}]  }
   0x1   :  { %9 = vsyncpa [#allocation6], 0 }
   0x2   :  { %10 = vsyncpa [#allocation4], 0  ;;  %s512_s12 = smov [#allocation2]  }
   0x3   :  { %s16_s13 = sshll.u32 %s512_s12, 4  ;;  %s17_s13 = int_to_ptr.vmem [resolvable:$true] %s16_s13 }
   0x4   :  { %s454_s14 = scalar_lea.vmem %s17_s13, 2048  ;;  %p459_p1 = scmp.lt.s32.totalorder %s17_s13, %s17_s13 }
   0x5   :  { %p455_p0 = scmp.ne.s32.totalorder %s17_s13, %s454_s14  ;;  %p460_p2 = scmp.lt.s32.totalorder %s454_s14, %s454_s14 }
   0x7   :  { %p461_p3 = por %p460_p2, %p459_p1 }
   0x9   :  { %p462_p4 = pnand %p461_p3, %p455_p0 }
   0xb   :  { %465 = shalt.err (!%p462_p4)
}
   0xc   :  { %s513_s15 = smov 512   ;;  %s514_s16 = smov 32  }
   0xd   :  { %22 = dma.hbm_to_vmem [thread:$0]  %s555_s0, 2048, %s17_s13, [#allocation3], %s513_s15, %s513_s15, %s514_s16  }
   0xe   :  { %s515_s19 = smov [#allocation5]  }
   0xf   :  { %s28_s20 = sshll.u32 %s515_s19, 4  ;;  %s29_s20 = int_to_ptr.vmem [resolvable:$true] %s28_s20 }
  0x10   :  { %s474_s21 = scalar_lea.vmem %s29_s20, 8192  ;;  %p479_p6 = scmp.lt.s32.totalorder %s29_s20, %s29_s20 }
  0x11   :  { %p475_p5 = scmp.ne.s32.totalorder %s29_s20, %s474_s21  ;;  %p480_p7 = scmp.lt.s32.totalorder %s474_s21, %s474_s21 }
  0x13   :  { %p481_p8 = por %p480_p7, %p479_p6 }
  0x15   :  { %p482_p9 = pnand %p481_p8, %p475_p5 }
  0x17   :  { %485 = shalt.err (!%p482_p9)
}
  0x18   :  { %s516_s22 = smov 128   ;;  %s517_s23 = smov 8  }
  0x19   :  { %34 = dma.hbm_to_vmem [thread:$0]  %s556_s1, 8192, %s29_s20, [#allocation6], %s516_s22, %s516_s22, %s517_s23  }
  0x1a   :  { %506 = dma.done.wait [#allocation3], 2048  }
  0x1b   :  { %507 = vsyncadd [#allocation3], 4294965248 }
  0x1c   :  { %508 = dma.done.wait [#allocation6], 8192  }
  0x1d   :  { %509 = vsyncadd [#allocation6], 4294959104  ;;  %v154_v0 = vld [vmem:[#allocation5 + $0xf8] sm:$0xff]  ;;  %v153_v4 = vld [vmem:[#allocation5 + $0xf0] sm:$0xff]  ;;  %vm202_vm0 = vcmask 1041409   ;;  %s518_s26 = smov [#allocation7]  }
  0x1e   :  { %v186_v1 = vld [vmem:[#allocation5 + $0x1f8] sm:$0xff]  ;;  %369 = vmatprep.subr.mxu0 %v154_v0  ;;  %v185_v5 = vld [vmem:[#allocation5 + $0x1f0] sm:$0xff]  ;;  %v152_v8 = vld [vmem:[#allocation5 + $0xe8] sm:$0xff]  ;;  %s358_s27 = sshll.u32 %s518_s26, 4  ;;  %s359_s27 = int_to_ptr.vmem [resolvable:$true] %s358_s27 }
  0x1f   :  { %v138_v2 = vld [vmem:[#allocation5 + $0x78] sm:$0xff]  ;;  %404 = vmatprep.subr.mxu1 %v186_v1  ;;  %v137_v6 = vld [vmem:[#allocation5 + $0x70] sm:$0xff]  ;;  %v184_v9 = vld [vmem:[#allocation5 + $0x1e8] sm:$0xff]  ;;  %s486_s28 = scalar_lea.vmem %s359_s27, 32  ;;  %p491_p11 = scmp.lt.s32.totalorder %s359_s27, %s359_s27 }
  0x20   :  { %v170_v3 = vld [vmem:[#allocation5 + $0x178] sm:$0xff]  ;;  %370 = vmatpush3.msra.mxu0 %v138_v2  ;;  %v169_v7 = vld [vmem:[#allocation5 + $0x170] sm:$0xff]  ;;  %v136_v10 = vld [vmem:[#allocation5 + $0x68] sm:$0xff]  ;;  %p487_p10 = scmp.ne.s32.totalorder %s359_s27, %s486_s28  ;;  %p492_p12 = scmp.lt.s32.totalorder %s486_s28, %s486_s28 }
  0x21   :  { %405 = vmatpush3.msra.mxu1 %v170_v3  ;;  %371 = vmatprep.subr.mxu0 %v153_v4  ;;  %v168_v11 = vld [vmem:[#allocation5 + $0x168] sm:$0xff]  ;;  %v151_v12 = vld [vmem:[#allocation5 + $0xe0] sm:$0xff]  ;;  %v150_v16 = vld [vmem:[#allocation5 + $0xd8] sm:$0xff] }
  0x22   :  { %406 = vmatprep.subr.mxu1 %v185_v5  ;;  %372 = vmatpush3.msra.mxu0 %v137_v6  ;;  %v183_v13 = vld [vmem:[#allocation5 + $0x1e0] sm:$0xff]  ;;  %v182_v17 = vld [vmem:[#allocation5 + $0x1d8] sm:$0xff]  ;;  %v149_v20 = vld [vmem:[#allocation5 + $0xd0] sm:$0xff]  ;;  %p493_p13 = por %p492_p12, %p491_p11 }
  0x23   :  { %407 = vmatpush3.msra.mxu1 %v169_v7  ;;  %373 = vmatprep.subr.mxu0 %v152_v8  ;;  %v135_v14 = vld [vmem:[#allocation5 + $0x60] sm:$0xff]  ;;  %v134_v18 = vld [vmem:[#allocation5 + $0x58] sm:$0xff]  ;;  %v181_v21 = vld [vmem:[#allocation5 + $0x1d0] sm:$0xff] }
  0x24   :  { %408 = vmatprep.subr.mxu1 %v184_v9  ;;  %v167_v15 = vld [vmem:[#allocation5 + $0x160] sm:$0xff]  ;;  %374 = vmatpush3.msra.mxu0 %v136_v10  ;;  %v166_v19 = vld [vmem:[#allocation5 + $0x158] sm:$0xff]  ;;  %v133_v22 = vld [vmem:[#allocation5 + $0x50] sm:$0xff]  ;;  %p494_p0 = pnand %p493_p13, %p487_p10 }
  0x25   :  { %409 = vmatpush3.msra.mxu1 %v168_v11  ;;  %375 = vmatprep.subr.mxu0 %v151_v12  ;;  %v165_v23 = vld [vmem:[#allocation5 + $0x150] sm:$0xff]  ;;  %v148_v24 = vld [vmem:[#allocation5 + $0xc8] sm:$0xff]  ;;  %v147_v28 = vld [vmem:[#allocation5 + $0xc0] sm:$0xff] }
  0x26   :  { %410 = vmatprep.subr.mxu1 %v183_v13  ;;  %376 = vmatpush3.msra.mxu0 %v135_v14  ;;  %v180_v25 = vld [vmem:[#allocation5 + $0x1c8] sm:$0xff]  ;;  %v179_v29 = vld [vmem:[#allocation5 + $0x1c0] sm:$0xff]  ;;  %v146_v32 = vld [vmem:[#allocation5 + $0xb8] sm:$0xff] }
  0x27   :  { %411 = vmatpush3.msra.mxu1 %v167_v15  ;;  %377 = vmatprep.subr.mxu0 %v150_v16  ;;  %v132_v26 = vld [vmem:[#allocation5 + $0x48] sm:$0xff]  ;;  %v131_v30 = vld [vmem:[#allocation5 + $0x40] sm:$0xff]  ;;  %v178_v33 = vld [vmem:[#allocation5 + $0x1b8] sm:$0xff] }
  0x28   :  { %412 = vmatprep.subr.mxu1 %v182_v17  ;;  %378 = vmatpush3.msra.mxu0 %v134_v18  ;;  %v164_v27 = vld [vmem:[#allocation5 + $0x148] sm:$0xff]  ;;  %v163_v31 = vld [vmem:[#allocation5 + $0x140] sm:$0xff]  ;;  %v130_v34 = vld [vmem:[#allocation5 + $0x38] sm:$0xff] }
  0x29   :  { %413 = vmatpush3.msra.mxu1 %v166_v19  ;;  %379 = vmatprep.subr.mxu0 %v149_v20  ;;  %v162_v35 = vld [vmem:[#allocation5 + $0x138] sm:$0xff]  ;;  %v145_v36 = vld [vmem:[#allocation5 + $0xb0] sm:$0xff]  ;;  %v144_v40 = vld [vmem:[#allocation5 + $0xa8] sm:$0xff] }
  0x2a   :  { %414 = vmatprep.subr.mxu1 %v181_v21  ;;  %380 = vmatpush3.msra.mxu0 %v133_v22  ;;  %v177_v37 = vld [vmem:[#allocation5 + $0x1b0] sm:$0xff]  ;;  %v176_v41 = vld [vmem:[#allocation5 + $0x1a8] sm:$0xff]  ;;  %v143_v44 = vld [vmem:[#allocation5 + $0xa0] sm:$0xff] }
  0x2b   :  { %415 = vmatpush3.msra.mxu1 %v165_v23  ;;  %381 = vmatprep.subr.mxu0 %v148_v24  ;;  %v129_v38 = vld [vmem:[#allocation5 + $0x30] sm:$0xff]  ;;  %v128_v42 = vld [vmem:[#allocation5 + $0x28] sm:$0xff]  ;;  %v175_v45 = vld [vmem:[#allocation5 + $0x1a0] sm:$0xff] }
  0x2c   :  { %416 = vmatprep.subr.mxu1 %v180_v25  ;;  %382 = vmatpush3.msra.mxu0 %v132_v26  ;;  %v161_v39 = vld [vmem:[#allocation5 + $0x130] sm:$0xff]  ;;  %v160_v43 = vld [vmem:[#allocation5 + $0x128] sm:$0xff]  ;;  %v127_v46 = vld [vmem:[#allocation5 + $0x20] sm:$0xff] }
  0x2d   :  { %417 = vmatpush3.msra.mxu1 %v164_v27  ;;  %383 = vmatprep.subr.mxu0 %v147_v28  ;;  %v159_v47 = vld [vmem:[#allocation5 + $0x120] sm:$0xff]  ;;  %v142_v48 = vld [vmem:[#allocation5 + $0x98] sm:$0xff]  ;;  %v44_v52 = vld [vmem:[#allocation2 + $0x8] sm:$0xff] }
  0x2e   :  { %418 = vmatprep.subr.mxu1 %v179_v29  ;;  %384 = vmatpush3.msra.mxu0 %v131_v30  ;;  %v174_v49 = vld [vmem:[#allocation5 + $0x198] sm:$0xff]  ;;  %v48_v53 = vld [vmem:[#allocation2 + $0x28] sm:$0xff]  ;;  %v141_v55 = vld [vmem:[#allocation5 + $0x90] sm:$0xff] }
  0x2f   :  { %419 = vmatpush3.msra.mxu1 %v163_v31  ;;  %385 = vmatprep.subr.mxu0 %v146_v32  ;;  %v126_v50 = vld [vmem:[#allocation5 + $0x18] sm:$0xff]  ;;  %v52_v54 = vld [vmem:[#allocation2 + $0x48] sm:$0xff]  ;;  %v173_v56 = vld [vmem:[#allocation5 + $0x190] sm:$0xff]  ;;  %v66_v58 = vadd.f32 %v48_v53, %v44_v52 }
  0x30   :  { %420 = vmatprep.subr.mxu1 %v178_v33  ;;  %386 = vmatpush3.msra.mxu0 %v130_v34  ;;  %v158_v51 = vld [vmem:[#allocation5 + $0x118] sm:$0xff]  ;;  %v56_v57 = vld [vmem:[#allocation2 + $0x68] sm:$0xff]  ;;  %v125_v60 = vld [vmem:[#allocation5 + $0x10] sm:$0xff] }
  0x31   :  { %421 = vmatpush3.msra.mxu1 %v162_v35  ;;  %387 = vmatprep.subr.mxu0 %v145_v36  ;;  %v46_v59 = vld [vmem:[#allocation2 + $0x18] sm:$0xff]  ;;  %v157_v61 = vld [vmem:[#allocation5 + $0x110] sm:$0xff]  ;;  %v94_v62 = vadd.f32 %v56_v57, %v52_v54  ;;  %v140_v2 = vld [vmem:[#allocation5 + $0x88] sm:$0xff]  ;;  %v67_v3 = vrot.slane %v66_v58, 4 }
  0x32   :  { %422 = vmatprep.subr.mxu1 %v177_v37  ;;  %388 = vmatpush3.msra.mxu0 %v129_v38  ;;  %v50_v63 = vld [vmem:[#allocation2 + $0x38] sm:$0xff]  ;;  %v43_v6 = vld [vmem:[#allocation2] sm:$0xff]  ;;  %v45_v12 = vld [vmem:[#allocation2 + $0x10] sm:$0xff] }
  0x33   :  { %423 = vmatpush3.msra.mxu1 %v161_v39  ;;  %389 = vmatprep.subr.mxu0 %v144_v40  ;;  %v54_v0 = vld [vmem:[#allocation2 + $0x58] sm:$0xff]  ;;  %v80_v4 = vadd.f32 %v50_v63, %v46_v59  ;;  %v47_v7 = vld [vmem:[#allocation2 + $0x20] sm:$0xff]  ;;  %v95_v9 = vrot.slane %v94_v62, 4  ;;  %v49_v13 = vld [vmem:[#allocation2 + $0x30] sm:$0xff]  ;;  %v68_v15 = vadd.f32 %v67_v3, %v66_v58 }
  0x34   :  { %424 = vmatprep.subr.mxu1 %v176_v41  ;;  %390 = vmatpush3.msra.mxu0 %v128_v42  ;;  %v58_v1 = vld [vmem:[#allocation2 + $0x78] sm:$0xff]  ;;  %v51_v8 = vld [vmem:[#allocation2 + $0x40] sm:$0xff]  ;;  %v59_v11 = vadd.f32 %v47_v7, %v43_v6  ;;  %v172_v14 = vld [vmem:[#allocation5 + $0x188] sm:$0xff]  ;;  %v73_v25 = vadd.f32 %v49_v13, %v45_v12 }
  0x35   :  { %425 = vmatpush3.msra.mxu1 %v160_v43  ;;  %391 = vmatprep.subr.mxu0 %v143_v44  ;;  %v108_v5 = vadd.f32 %v58_v1, %v54_v0  ;;  %v55_v10 = vld [vmem:[#allocation2 + $0x60] sm:$0xff]  ;;  %v81_v16 = vrot.slane %v80_v4, 4  ;;  %v53_v19 = vld [vmem:[#allocation2 + $0x50] sm:$0xff]  ;;  %v124_v21 = vld [vmem:[#allocation5 + $0x8] sm:$0xff]  ;;  %v96_v23 = vadd.f32 %v95_v9, %v94_v62  ;;  %v69_v29 = vrot.slane %v68_v15, 2 }
  0x36   :  { %426 = vmatprep.subr.mxu1 %v175_v45  ;;  %392 = vmatpush3.msra.mxu0 %v127_v46  ;;  %v87_v18 = vadd.f32 %v55_v10, %v51_v8  ;;  %v57_v20 = vld [vmem:[#allocation2 + $0x70] sm:$0xff]  ;;  %v156_v22 = vld [vmem:[#allocation5 + $0x108] sm:$0xff]  ;;  %v60_v24 = vrot.slane %v59_v11, 4  ;;  %v139_v27 = vld [vmem:[#allocation5 + $0x80] sm:$0xff]  ;;  %v74_v37 = vrot.slane %v73_v25, 4 }
  0x37   :  { %427 = vmatpush3.msra.mxu1 %v159_v47  ;;  %393 = vmatprep.subr.mxu0 %v142_v48  ;;  %v109_v17 = vrot.slane %v108_v5, 4  ;;  %v101_v26 = vadd.f32 %v57_v20, %v53_v19  ;;  %v171_v28 = vld [vmem:[#allocation5 + $0x180] sm:$0xff]  ;;  %v82_v30 = vadd.f32 %v81_v16, %v80_v4  ;;  %v97_v34 = vrot.slane %v96_v23, 2 }
  0x38   :  { %428 = vmatprep.subr.mxu1 %v174_v49  ;;  %394 = vmatpush3.msra.mxu0 %v126_v50  ;;  %v88_v32 = vrot.slane %v87_v18, 4  ;;  %v123_v33 = vld [vmem:[#allocation5] sm:$0xff]  ;;  %v61_v36 = vadd.f32 %v60_v24, %v59_v11  ;;  %v70_v39 = vadd.f32 %v69_v29, %v68_v15  ;;  %v75_v45 = vadd.f32 %v74_v37, %v73_v25 }
  0x39   :  { %429 = vmatpush3.msra.mxu1 %v158_v51  ;;  %395 = vmatprep.subr.mxu0 %v141_v55  ;;  %v110_v31 = vadd.f32 %v109_v17, %v108_v5  ;;  %v155_v35 = vld [vmem:[#allocation5 + $0x100] sm:$0xff]  ;;  %v102_v38 = vrot.slane %v101_v26, 4  ;;  %v83_v40 = vrot.slane %v82_v30, 2  ;;  %v98_v43 = vadd.f32 %v97_v34, %v96_v23 }
  0x3a   :  { %430 = vmatprep.subr.mxu1 %v173_v56  ;;  %396 = vmatpush3.msra.mxu0 %v125_v60  ;;  %v89_v42 = vadd.f32 %v88_v32, %v87_v18  ;;  %v62_v44 = vrot.slane %v61_v36, 2  ;;  %v71_v47 = vrot.slane %v70_v39, 1  ;;  %v76_v53 = vrot.slane %v75_v45, 2 }
  0x3b   :  { %431 = vmatpush3.msra.mxu1 %v157_v61  ;;  %397 = vmatprep.subr.mxu0 %v140_v2  ;;  %v111_v41 = vrot.slane %v110_v31, 2  ;;  %v103_v46 = vadd.f32 %v102_v38, %v101_v26  ;;  %v84_v48 = vadd.f32 %v83_v40, %v82_v30  ;;  %v99_v51 = vrot.slane %v98_v43, 1 }
  0x3c   :  { %432 = vmatprep.subr.mxu1 %v172_v14  ;;  %398 = vmatpush3.msra.mxu0 %v124_v21  ;;  %v90_v50 = vrot.slane %v89_v42, 2  ;;  %v63_v52 = vadd.f32 %v62_v44, %v61_v36  ;;  %v72_v55 = vadd.f32 %v71_v47, %v70_v39  ;;  %v77_v61 = vadd.f32 %v76_v53, %v75_v45 }
  0x3d   :  { %433 = vmatpush3.msra.mxu1 %v156_v22  ;;  %399 = vmatprep.subr.mxu0 %v139_v27  ;;  %v112_v49 = vadd.f32 %v111_v41, %v110_v31  ;;  %v104_v54 = vrot.slane %v103_v46, 2  ;;  %v85_v56 = vrot.slane %v84_v48, 1  ;;  %v100_v59 = vadd.f32 %v99_v51, %v98_v43  ;;  %v368_v22 = vld [vmem:[%s557_s2] ss:$0 sm:$0xff] }
  0x3e   :  { %434 = vmatprep.subr.mxu1 %v171_v28  ;;  %400 = vmatpush3.msra.mxu0 %v123_v33  ;;  %v91_v58 = vadd.f32 %v90_v50, %v89_v42  ;;  %v64_v60 = vrot.slane %v63_v52, 1  ;;  %v116_v63 = vmul.f32 0.0625, %v72_v55  ;;  %v78_v5 = vrot.slane %v77_v61, 1 }
  0x3f   :  { %435 = vmatpush3.msra.mxu1 %v155_v35  ;;  %v113_v57 = vrot.slane %v112_v49, 1  ;;  %v105_v62 = vadd.f32 %v104_v54, %v103_v46  ;;  %v86_v0 = vadd.f32 %v85_v56, %v84_v48  ;;  %v120_v3 = vmul.f32 0.0625, %v100_v59 }
  0x40   :  { %v92_v2 = vrot.slane %v91_v58, 1  ;;  %v65_v4 = vadd.f32 %v64_v60, %v63_v52  ;;  %v79_v12 = vadd.f32 %v78_v5, %v77_v61 }
  0x41   :  { %v114_v1 = vadd.f32 %v113_v57, %v112_v49  ;;  %v106_v6 = vrot.slane %v105_v62, 1  ;;  %v118_v7 = vmul.f32 0.0625, %v86_v0  ;;  %v204_v10 = vsel %vm202_vm0, %v120_v3, %v116_v63 }
  0x42   :  { %v93_v9 = vadd.f32 %v92_v2, %v91_v58  ;;  %v115_v11 = vmul.f32 0.0625, %v65_v4  ;;  %275 = vmatprep.mubr.f32.mxu0 %v204_v10  ;;  %v117_v16 = vmul.f32 0.0625, %v79_v12 }
  0x43   :  { %v122_v8 = vmul.f32 0.0625, %v114_v1  ;;  %v107_v13 = vadd.f32 %v106_v6, %v105_v62 }
  0x44   :  { %v119_v15 = vmul.f32 0.0625, %v93_v9 }
  0x45   :  { %v206_v14 = vsel %vm202_vm0, %v122_v8, %v118_v7  ;;  %v121_v17 = vmul.f32 0.0625, %v107_v13 }
  0x46   :  { %345 = vmatprep.mubr.f32.mxu1 %v206_v14  ;;  %v203_v18 = vsel %vm202_vm0, %v119_v15, %v115_v11 }
  0x47   :  { %276 = vmatmul.mubr.f32.vlgmr.msra.gmra.mxu0 %v203_v18  ;;  %v205_v19 = vsel %vm202_vm0, %v121_v17, %v117_v16 }
  0x48   :  { %346 = vmatmul.mubr.f32.vlgmr.msra.gmra.mxu1 %v205_v19 }
 0x107   :  { %v401_v20 = vpop.f32.mrf.mxu0 }
 0x108   :  { %v436_v21 = vpop.f32.mrf.mxu1 }
 0x109   :  { %v402_v23 = vpop.f32.mrf.mxu0 }
 0x10a   :  { %v403_v24 = vadd.f32 %v402_v23, %v401_v20  ;;  %v437_v25 = vpop.f32.mrf.mxu1 }
 0x10b   :  { %v438_v27 = vadd.f32 %v437_v25, %v436_v21 }
 0x10c   :  { %v278_v26 = vadd.f32 %v403_v24, %v368_v22 }
 0x10e   :  { %v348_v28 = vadd.f32 %v438_v27, %v278_v26 }
 0x110   :  { %351 = vst [vmem:[#allocation7] sm:$0x3] %v348_v28 }
 0x111   :  { %497 = shalt.err (!%p494_p0)
}
 0x112   :  { %361 = dma.vmem_to_hbm [thread:$0]  %s359_s27, 32, %s558_s3, [#allocation4]  }
 0x113   :  { %510 = dma.done.wait [#allocation4], 32  }
 0x114   :  { %511 = vsyncadd [#allocation4], 4294967264 }
 0x115   :  { %365 = vsyncpa [#allocation3], 1 }
 0x116   :  { %366 = vsyncpa [#allocation6], 1 }
 0x117   :  { %367 = vsyncpa [#allocation4], 1 }

</bundles_post_ra>
